<compile_context>
chip_gen: v7x
topology: tpu7x:2x2x1
jax: 0.10.0
libtpu: 0.0.40
codegen_flags: <defaults>
</compile_context>

<pallas_src>
from functools import partial

import jax
import jax.numpy as jnp
from jax.experimental import pallas as pl
from jax.experimental.pallas import tpu as pltpu

LANES = 128
_MIB = 1024 * 1024
PASS1_BLOCK_BYTES = 8 * _MIB      # reduce pass: input only, 2 bufs -> 16 MiB
PASS2_BLOCK_BYTES = 4 * _MIB      # mask pass: in+out double-buffered -> 16 MiB
TWO_PASS_VMEM_LIMIT = 48 * _MIB   # <= 3/4 of the smallest (v7x, 64 MiB) VMEM


def _round_up(v, m):
    return ((v + m - 1) // m) * m


def _vmem_capacity_bytes():
    """Per-core VMEM capacity; conservative 64 MiB (v7x) fallback."""
    try:
        cap = int(pltpu.get_tpu_info().vmem_capacity_bytes)
        if cap > 0:
            return cap
    except Exception:
        pass
    return 64 * _MIB


def _num_reduce_splits():
    """2-way reduction split only on chips exposing 2 TensorCores per device."""
    try:
        kind = jax.devices()[0].device_kind.lower()
    except Exception:
        return 1
    if any(tag in kind for tag in ("v4", "v5p", "v7", "7x")):
        return 2
    return 1


def _block_rows_for(target_bytes, itemsize, rows):
    r = max(8, (target_bytes // (LANES * itemsize)) // 8 * 8)
    return min(r, _round_up(rows, 8))


def _fused_kernel(x_ref, o_ref, *, keep, native_cmp, reduce_in_f32):
    """Whole tensor resident in VMEM: min/max + threshold mask in one pass."""
    x = x_ref[...]
    xr = x.astype(jnp.float32) if reduce_in_f32 else x
    xmin = jnp.min(xr).astype(jnp.float32)
    xmax = jnp.max(xr).astype(jnp.float32)
    thr = xmin + keep * (xmax - xmin)
    if native_cmp:
        hit = x > thr.astype(x.dtype)
    else:
        hit = x.astype(jnp.float32) > thr
    o_ref[...] = jnp.where(hit, jnp.zeros_like(x), x)


def _minmax_kernel(x_ref, min_ref, max_ref, vmin_sc, vmax_sc, *,
                   total_rows, block_rows, total_blocks, nsplit, ragged,
                   min_fill, max_fill):
    """Pass 1: per-split running (1, 128) min/max partials over large blocks.

    Per grid step the work is elementwise VPU min/max (plus one tiny sublane
    reduce); the cross-lane reduce to a scalar and the SMEM store happen
    exactly once per split, at the last grid step.
    """
    c = pl.program_id(0)            # "parallel" split (sharded on 2-TC chips)
    i = pl.program_id(1)            # "arbitrary" reduction axis

    @pl.when(i == 0)
    def _():
        vmin_sc[...] = jnp.full((1, LANES), jnp.inf, jnp.float32)
        vmax_sc[...] = jnp.full((1, LANES), -jnp.inf, jnp.float32)

    if nsplit == 1:
        blk = i
    else:
        # Must match the input index_map (interleaved over splits, clamped so
        # duplicated trailing iterations re-read a valid block - idempotent).
        blk = jnp.minimum(i * nsplit + c, total_blocks - 1)

    x = x_ref[...]

    def _acc(lo, hi):
        vmin_sc[...] = jnp.minimum(
            vmin_sc[...], jnp.min(lo, axis=0, keepdims=True).astype(jnp.float32))
        vmax_sc[...] = jnp.maximum(
            vmax_sc[...], jnp.max(hi, axis=0, keepdims=True).astype(jnp.float32))

    if ragged:
        # Only the last block can contain rows past the end of the tensor;
        # every other block takes the mask-free fast path (no iota / where).
        @pl.when(blk == total_blocks - 1)
        def _():
            row = blk * block_rows + jax.lax.broadcasted_iota(
                jnp.int32, x.shape, 0)
            valid = row < total_rows
            _acc(jnp.where(valid, x, min_fill), jnp.where(valid, x, max_fill))

        @pl.when(blk != total_blocks - 1)
        def _():
            _acc(x, x)
    else:
        _acc(x, x)

    @pl.when(i == pl.num_programs(1) - 1)
    def _():
        min_ref[0, 0] = jnp.min(vmin_sc[...])
        max_ref[0, 0] = jnp.max(vmax_sc[...])


def _mask_kernel(min_ref, max_ref, x_ref, o_ref, *, keep, nsplit, native_cmp):
    """Pass 2: combine the per-split partials (SMEM scalars), compute the
    global threshold in-kernel, and zero every element above it."""
    xmin = min_ref[0, 0]
    xmax = max_ref[0, 0]
    for s in range(1, nsplit):          # static, nsplit <= 2
        xmin = jnp.minimum(xmin, min_ref[s, 0])
        xmax = jnp.maximum(xmax, max_ref[s, 0])
    thr = xmin + keep * (xmax - xmin)

    x = x_ref[...]
    if native_cmp:
        hit = x > thr.astype(x.dtype)   # bf16/f16: no per-element f32 widen
    else:
        hit = x.astype(jnp.float32) > thr
    o_ref[...] = jnp.where(hit, jnp.zeros_like(x), x)


def max_dropout(x, drop=0.3, training=True, *,
                block_rows=None, fuse_bytes_limit=None):
    """MaxDropout forward: zero elements whose min-max-normalized value
    exceeds 1 - drop.  Identity when training is False."""
    if drop < 0 or drop > 1:
        raise ValueError(
            "dropout probability has to be between 0 and 1, but got {}".format(drop))
    if not training:
        return x
    keep = 1.0 - drop

    orig_shape = x.shape
    orig_dtype = x.dtype
    n = x.size
    if n == 0:
        return x

    flat = x.reshape(-1)
    rem = (-n) % LANES
    if rem:
        # TODO(synk): a fully pad-free ragged path needs in-kernel handling of
        # a 1-D lane remainder; padding with a real element keeps min/max
        # exact and only triggers when numel % 128 != 0.
        flat = jnp.concatenate([flat, jnp.broadcast_to(flat[:1], (rem,))])
    rows = flat.shape[0] // LANES
    x2d = flat.reshape(rows, LANES)

    itemsize = jnp.dtype(orig_dtype).itemsize
    tensor_bytes = rows * LANES * itemsize

    vmem_cap = _vmem_capacity_bytes()
    if fuse_bytes_limit is None:
        # Generation-aware fused threshold: 16 MiB on 128 MiB VMEM (v5e/v6e),
        # 8 MiB on 64 MiB VMEM (v7x).
        fuse_bytes_limit = vmem_cap // 8

    is_float = bool(jnp.issubdtype(orig_dtype, jnp.floating))
    native_cmp = bool(is_float and itemsize < 4)   # bf16/f16/f8 compare natively
    reduce_in_f32 = not is_float                   # ints reduce in f32

    if tensor_bytes <= fuse_bytes_limit:
        # Single fused pass: 1x HBM read + 1x HBM write.
        out2d = pl.pallas_call(
            partial(_fused_kernel, keep=keep, native_cmp=native_cmp,
                    reduce_in_f32=reduce_in_f32),
            out_shape=jax.ShapeDtypeStruct(x2d.shape, x2d.dtype),
            compiler_params=pltpu.CompilerParams(
                vmem_limit_bytes=int(vmem_cap * 3 // 4)),
            cost_estimate=pl.CostEstimate(
                flops=4 * rows * LANES, transcendentals=0,
                bytes_accessed=2 * tensor_bytes),
        )(x2d)
    else:
        if block_rows is not None:
            br1 = br2 = min(_round_up(max(8, int(block_rows)), 8),
                            _round_up(rows, 8))
        else:
            br1 = _block_rows_for(PASS1_BLOCK_BYTES, itemsize, rows)
            br2 = _block_rows_for(PASS2_BLOCK_BYTES, itemsize, rows)

        # ---------------- pass 1: global min / max ----------------
        total_blocks1 = pl.cdiv(rows, br1)
        nsplit = min(_num_reduce_splits(), total_blocks1)
        blocks_per_split = pl.cdiv(total_blocks1, nsplit)
        ragged1 = (rows % br1) != 0
        if is_float:
            fi = jnp.finfo(orig_dtype)
            min_fill, max_fill = float(fi.max), float(fi.min)
        else:
            ii = jnp.iinfo(orig_dtype)
            min_fill, max_fill = int(ii.max), int(ii.min)

        if nsplit == 1:
            x_map1 = lambda c, i: (i, 0)
        else:
            x_map1 = lambda c, i: (jnp.minimum(i * nsplit + c,
                                               total_blocks1 - 1), 0)

        mins, maxs = pl.pallas_call(
            partial(_minmax_kernel, total_rows=rows, block_rows=br1,
                    total_blocks=total_blocks1, nsplit=nsplit, ragged=ragged1,
                    min_fill=min_fill, max_fill=max_fill),
            out_shape=(jax.ShapeDtypeStruct((nsplit, 1), jnp.float32),
                       jax.ShapeDtypeStruct((nsplit, 1), jnp.float32)),
            grid=(nsplit, blocks_per_split),
            in_specs=[pl.BlockSpec((br1, LANES), x_map1)],
            out_specs=(
                pl.BlockSpec((1, 1), lambda c, i: (c, 0),
                             memory_space=pltpu.SMEM),
                pl.BlockSpec((1, 1), lambda c, i: (c, 0),
                             memory_space=pltpu.SMEM),
            ),
            scratch_shapes=[pltpu.VMEM((1, LANES), jnp.float32),
                            pltpu.VMEM((1, LANES), jnp.float32)],
            compiler_params=pltpu.CompilerParams(
                dimension_semantics=("parallel", "arbitrary"),
                vmem_limit_bytes=TWO_PASS_VMEM_LIMIT),
            cost_estimate=pl.CostEstimate(
                flops=2 * rows * LANES, transcendentals=0,
                bytes_accessed=tensor_bytes),
        )(x2d)

        # ---------------- pass 2: threshold mask ----------------
        total_blocks2 = pl.cdiv(rows, br2)
        out2d = pl.pallas_call(
            partial(_mask_kernel, keep=keep, nsplit=nsplit,
                    native_cmp=native_cmp),
            out_shape=jax.ShapeDtypeStruct(x2d.shape, x2d.dtype),
            grid=(total_blocks2,),
            in_specs=[
                pl.BlockSpec((nsplit, 1), lambda i: (0, 0),
                             memory_space=pltpu.SMEM),
                pl.BlockSpec((nsplit, 1), lambda i: (0, 0),
                             memory_space=pltpu.SMEM),
                pl.BlockSpec((br2, LANES), lambda i: (i, 0)),
            ],
            out_specs=pl.BlockSpec((br2, LANES), lambda i: (i, 0)),
            compiler_params=pltpu.CompilerParams(
                dimension_semantics=("parallel",),
                vmem_limit_bytes=TWO_PASS_VMEM_LIMIT),
            cost_estimate=pl.CostEstimate(
                flops=2 * rows * LANES, transcendentals=0,
                bytes_accessed=2 * tensor_bytes),
        )(mins, maxs, x2d)

    out_flat = out2d.reshape(-1)
    if rem:
        out_flat = out_flat[:n]
    return out_flat.reshape(orig_shape)


if __name__ == "__main__":
    key = jax.random.PRNGKey(0)
    k1, k2, k3 = jax.random.split(key, 3)

    def reference(x, drop):
        xmin = x.min()
        xmax = x.max()
        norm = (x - xmin) / (xmax - xmin)
        return jnp.where(norm > (1.0 - drop), jnp.zeros_like(x), x)

    # Small NCHW activation (numel % 128 == 0) -> fused single-pass path.
    x = jax.random.normal(k1, (2, 4, 16, 16), dtype=jnp.float32)
    out = jax.block_until_ready(max_dropout(x, drop=0.3, training=True))
    ref = reference(x, 0.3)
    assert out.shape == x.shape and out.dtype == x.dtype
    assert jnp.allclose(out, ref, atol=1e-6), "fused path mismatch vs reference"

    # Same tensor forced through the two-pass path with tiny blocks to
    # exercise the split reduction / multi-block accumulation / mask pass.
    out2 = jax.block_until_ready(
        max_dropout(x, drop=0.3, training=True, block_rows=8, fuse_bytes_limit=0))
    assert jnp.allclose(out2, ref, atol=1e-6), "two-pass path mismatch"

    # Odd-sized tensor (numel % 128 != 0) through the two-pass path
    # (exercises lane padding + last-block-only row masking).
    y = jax.random.normal(k2, (3, 5, 7, 11), dtype=jnp.float32)
    refy = reference(y, 0.3)
    outy = jax.block_until_ready(
        max_dropout(y, drop=0.3, training=True, block_rows=8, fuse_bytes_limit=0))
    assert outy.shape == y.shape and outy.dtype == y.dtype
    assert jnp.allclose(outy, refy, atol=1e-6), "ragged path mismatch"

    # Mid-size tensor (2 MiB): default config takes the fused path on every
    # generation; also force the two-pass path with default block sizing to
    # check the large-tensor configuration end to end.
    z = jax.random.normal(k3, (4, 8, 128, 128), dtype=jnp.float32)
    refz = reference(z, 0.45)
    outz = jax.block_until_ready(max_dropout(z, drop=0.45, training=True))
    assert jnp.allclose(outz, refz, atol=1e-6), "mid-size fused path mismatch"
    outz2 = jax.block_until_ready(
        max_dropout(z, drop=0.45, training=True, fuse_bytes_limit=0))
    assert jnp.allclose(outz2, refz, atol=1e-6), "mid-size two-pass path mismatch"

    # Eval mode is identity.
    out_eval = jax.block_until_ready(max_dropout(x, drop=0.3, training=False))
    assert jnp.array_equal(out_eval, x)

    print("KERNEL_OK")
</pallas_src>

<mosaic_0001>
module attributes {stable_mosaic.version = 11 : i64} {
  func.func @_fused_kernel(%arg0: memref<16x128xf32, #tpu.memory_space<vmem>>, %arg1: memref<16x128xf32, #tpu.memory_space<vmem>>) attributes {dimension_semantics = [], scalar_prefetch = 0 : i64, scratch_operands = 0 : i64, tpu.core_type = #tpu.core_type<tc>} {
    %c0 = arith.constant 0 : index
    %c0_0 = arith.constant 0 : index
    %0 = vector.load %arg0[%c0, %c0_0] : memref<16x128xf32, #tpu.memory_space<vmem>>, vector<16x128xf32>
    %1 = vector.shape_cast %0 : vector<16x128xf32> to vector<1x16x128xf32>
    %cst = arith.constant dense<0x7F800000> : vector<1xf32>
    %2 = vector.multi_reduction <minimumf>, %1, %cst [1, 2] : vector<1x16x128xf32> to vector<1xf32>
    %3 = vector.shape_cast %2 : vector<1xf32> to vector<1x1x1xf32>
    %4 = vector.extract %3[0, 0, 0] : f32 from vector<1x1x1xf32>
    %5 = vector.shape_cast %0 : vector<16x128xf32> to vector<1x16x128xf32>
    %cst_1 = arith.constant dense<0xFF800000> : vector<1xf32>
    %6 = vector.multi_reduction <maximumf>, %5, %cst_1 [1, 2] : vector<1x16x128xf32> to vector<1xf32>
    %7 = vector.shape_cast %6 : vector<1xf32> to vector<1x1x1xf32>
    %8 = vector.extract %7[0, 0, 0] : f32 from vector<1x1x1xf32>
    %9 = arith.subf %8, %4 : f32
    %cst_2 = arith.constant 0.699999988 : f32
    %10 = arith.mulf %cst_2, %9 : f32
    %11 = arith.addf %4, %10 : f32
    %12 = vector.broadcast %11 : f32 to vector<16x128xf32>
    %13 = arith.cmpf ogt, %0, %12 : vector<16x128xf32>
    %cst_3 = arith.constant 0.000000e+00 : f32
    %14 = vector.broadcast %cst_3 : f32 to vector<16x128xf32>
    %15 = arith.select %13, %14, %0 : vector<16x128xi1>, vector<16x128xf32>
    %c0_4 = arith.constant 0 : index
    %c0_5 = arith.constant 0 : index
    %16 = vector.load %arg1[%c0_4, %c0_5] : memref<16x128xf32, #tpu.memory_space<vmem>>, vector<16x128xf32>
    tpu.vector_store %arg1[%c0_4, %c0_5], %15 {strides = array<i32>} : memref<16x128xf32, #tpu.memory_space<vmem>>, vector<16x128xf32>,
    return
  }
}

</mosaic_0001>

<bundles_post_ra>
// kernel: tpu_custom_call.1
= control target key start
LH: loop header
LB: loop body
LE: loop exit
PB: predicated region body
PF: predicated region fallthrough
CT: control target
= control target key end

     0   :  { %6 = vsyncpa [#allocation3], 0  ;;  %s172_s0 = inlined_call_operand.hbm [shape: f32[16,128], index: 0, kind: input, shape index: {}]   ;;  %s173_s1 = inlined_call_operand.hbm [shape: f32[16,128], index: 1, kind: output, shape index: {}]  }
   0x1   :  { %7 = vsyncpa [#allocation4], 0  ;;  %s128_s6 = smov [#allocation2]   ;;  %s80_s10 = scalar_lea.hbm %s172_s0, 256 }
   0x2   :  { %s13_s7 = sshll.u32 %s128_s6, 4  ;;  %p81_p0 = scmp.ne.s32.totalorder %s172_s0, %s80_s10  ;;  %s14_s7 = int_to_ptr.vmem [resolvable:$true] %s13_s7 }
   0x3   :  { %p84_p1 = scmp.lt.u32.totalorder %s80_s10, %s172_s0 }
   0x5   :  { %p86_p2 = pnand %p84_p1, %p81_p0 }
   0x7   :  { %89 = shalt.err (!%p86_p2)
}
   0x8   :  { %s90_s15 = scalar_lea.vmem %s14_s7, 256  ;;  %p95_p4 = scmp.lt.s32.totalorder %s14_s7, %s14_s7 }
   0x9   :  { %p91_p3 = scmp.ne.s32.totalorder %s14_s7, %s90_s15  ;;  %p96_p5 = scmp.lt.s32.totalorder %s90_s15, %s90_s15 }
   0xb   :  { %p97_p6 = por %p96_p5, %p95_p4 }
   0xd   :  { %p98_p7 = pnand %p97_p6, %p91_p3 }
   0xf   :  { %101 = shalt.err (!%p98_p7)
}
  0x10   :  { %s129_s16 = smov 128   ;;  %s130_s17 = smov 8  }
  0x11   :  { %19 = dma.hbm_to_vmem [thread:$0]  %s172_s0, 256, %s14_s7, [#allocation3], %s129_s16, %s129_s16, %s130_s17  }
  0x12   :  { %124 = dma.done.wait [#allocation3], 256  }
  0x13   :  { %125 = vsyncadd [#allocation3], 4294967040  ;;  %v23_v0 = vld [vmem:[#allocation2] sm:$0xff]  ;;  %v24_v1 = vld [vmem:[#allocation2 + $0x8] sm:$0xff]  ;;  %s131_s24 = smov [#allocation5]  }
  0x14   :  { %v25_v2 = vmin.f32 %v23_v0, %v24_v1  ;;  %v35_v3 = vmax.f32 %v23_v0, %v24_v1  ;;  %s60_s25 = sshll.u32 %s131_s24, 4  ;;  %s61_s25 = int_to_ptr.vmem [resolvable:$true] %s60_s25 }
  0x15   :  { %s102_s26 = scalar_lea.vmem %s61_s25, 256  ;;  %p107_p9 = scmp.lt.s32.totalorder %s61_s25, %s61_s25 }
  0x16   :  { %26 = vmin.xlane.f32.xlu0 %v25_v2  ;;  %p103_p8 = scmp.ne.s32.totalorder %s61_s25, %s102_s26  ;;  %p108_p10 = scmp.lt.s32.totalorder %s102_s26, %s102_s26 }
  0x18   :  { %p109_p11 = por %p108_p10, %p107_p9 }
  0x1a   :  { %36 = vmax.xlane.f32.xlu0 %v35_v3  ;;  %p110_p12 = pnand %p109_p11, %p103_p8 }
  0xa3   :  { %v27_v4 = vpop.xlane.xlu0 %26 }
  0xa4   :  { %v28_v5 = vrot.slane %v27_v4, 4 }
  0xa6   :  { %v29_v6 = vmin.f32 %v27_v4, %v28_v5 }
  0xa7   :  { %v37_v7 = vpop.xlane.xlu0 %36 }
  0xa8   :  { %v30_v8 = vrot.slane %v29_v6, 2  ;;  %v38_v9 = vrot.slane %v37_v7, 4 }
  0xaa   :  { %v39_v10 = vmax.f32 %v37_v7, %v38_v9  ;;  %v31_v11 = vmin.f32 %v29_v6, %v30_v8 }
  0xac   :  { %v40_v12 = vrot.slane %v39_v10, 2  ;;  %v32_v13 = vrot.slane %v31_v11, 1 }
  0xae   :  { %v41_v14 = vmax.f32 %v39_v10, %v40_v12  ;;  %v33_v15 = vmin.f32 %v31_v11, %v32_v13 }
  0xb0   :  { %72 = vpush %v33_v15  ;;  %v42_v16 = vrot.slane %v41_v14, 1 }
  0xb2   :  { %v43_v17 = vmax.f32 %v41_v14, %v42_v16 }
  0xb4   :  { %74 = vpush %v43_v17 }
  0xe1   :  { %s73_s0 = spop %72 }
  0xe5   :  { %s75_s20 = spop %74 }
  0xe6   :  { %s45_s21 = ssub.f32 %s75_s20, %s73_s0 }
  0xe8   :  { %s46_s22 = smul.f32 0.7, %s45_s21 }
  0xea   :  { %s47_s23 = sadd.f32 %s73_s0, %s46_s22 }
  0xec   :  { %v48_v18 = vstv %s47_s23 }
  0xed   :  { %vm49_vm0 = vcmp.gt.f32.partialorder %v23_v0, %v48_v18  ;;  %vm50_vm1 = vcmp.gt.f32.partialorder %v24_v1, %v48_v18 }
  0xee   :  { %v51_v19 = vsel %vm49_vm0, 0.0, %v23_v0  ;;  %v52_v20 = vsel %vm50_vm1, 0.0, %v24_v1 }
  0xef   :  { %53 = vst [vmem:[#allocation5] sm:$0xff] %v51_v19  ;;  %54 = vst [vmem:[#allocation5 + $0x8] sm:$0xff] %v52_v20 }
  0xf0   :  { %113 = shalt.err (!%p110_p12)
}
  0xf1   :  { %s114_s29 = scalar_lea.hbm %s173_s1, 256 }
  0xf2   :  { %p115_p13 = scmp.ne.s32.totalorder %s173_s1, %s114_s29  ;;  %p118_p0 = scmp.lt.u32.totalorder %s114_s29, %s173_s1 }
  0xf4   :  { %p120_p1 = pnand %p118_p0, %p115_p13 }
  0xf6   :  { %123 = shalt.err (!%p120_p1)
}
  0xf7   :  { %66 = dma.vmem_to_hbm [thread:$0]  %s61_s25, 256, %s173_s1, [#allocation4], %s129_s16, %s129_s16, %s130_s17  }
  0xf8   :  { %126 = dma.done.wait [#allocation4], 256  }
  0xf9   :  { %127 = vsyncadd [#allocation4], 4294967040 }
  0xfa   :  { %70 = vsyncpa [#allocation3], 1 }
  0xfb   :  { %71 = vsyncpa [#allocation4], 1 }

</bundles_post_ra>
